<compile_context>
chip_gen: v7x
topology: tpu7x:2x2x1
jax: 0.10.0
libtpu: 0.0.40
codegen_flags: <defaults>
</compile_context>

<pallas_src>
import math
import jax
import jax.numpy as jnp
from jax import lax
from jax.experimental import pallas as pl
from jax.experimental.pallas import tpu as pltpu


# --------------------------------------------------------------------------
# Generic tiled matmul: bf16 MXU inputs, f32 accumulation.
# --------------------------------------------------------------------------
def _matmul_kernel(x_ref, w_ref, o_ref, acc_ref):
    @pl.when(pl.program_id(2) == 0)
    def _():
        acc_ref[...] = jnp.zeros_like(acc_ref)

    acc_ref[...] += jnp.dot(x_ref[...], w_ref[...],
                            preferred_element_type=jnp.float32)

    @pl.when(pl.program_id(2) == pl.num_programs(2) - 1)
    def _():
        o_ref[...] = acc_ref[...].astype(o_ref.dtype)


def _fit(n, pref):
    # Use the preferred tile if it divides n, otherwise take the full extent
    # (small-model / test-shape path: the whole axis fits in VMEM).
    return pref if n % pref == 0 else n


def matmul_bf16(x, w, *, out_dtype, tm=128, tn=512, tk=512):
    """x:(M,K) @ w:(K,N) -> (M,N). Inputs cast to bf16, f32 accumulation."""
    M, K = x.shape
    K2, N = w.shape
    assert K == K2
    tm, tn, tk = _fit(M, tm), _fit(N, tn), _fit(K, tk)
    grid = (M // tm, N // tn, K // tk)
    return pl.pallas_call(
        _matmul_kernel,
        out_shape=jax.ShapeDtypeStruct((M, N), out_dtype),
        grid_spec=pltpu.PrefetchScalarGridSpec(
            num_scalar_prefetch=0,
            grid=grid,
            in_specs=[pl.BlockSpec((tm, tk), lambda i, j, k: (i, k)),
                      pl.BlockSpec((tk, tn), lambda i, j, k: (k, j))],
            out_specs=pl.BlockSpec((tm, tn), lambda i, j, k: (i, j)),
            scratch_shapes=[pltpu.VMEM((tm, tn), jnp.float32)],
        ),
        compiler_params=pltpu.CompilerParams(
            dimension_semantics=("parallel", "parallel", "arbitrary"),
            vmem_limit_bytes=48 * 1024 * 1024,
        ),
    )(x.astype(jnp.bfloat16), w.astype(jnp.bfloat16))


# --------------------------------------------------------------------------
# Flash attention (causal) with fused RoPE.
# Grid = (batch, heads, q_tiles, kv_tiles); kv axis innermost / "arbitrary".
# --------------------------------------------------------------------------
def _flash_attn_kernel(q_ref, k_ref, v_ref, cq_ref, sq_ref, ck_ref, sk_ref,
                       o_ref, m_scr, l_scr, acc_scr):
    tq, hd = q_ref.shape
    tk = k_ref.shape[0]
    qi = pl.program_id(2)
    ki = pl.program_id(3)

    @pl.when(ki == 0)
    def _():
        m_scr[...] = jnp.full_like(m_scr, -1e30)
        l_scr[...] = jnp.zeros_like(l_scr)
        acc_scr[...] = jnp.zeros_like(acc_scr)

    # Skip key blocks strictly above the causal diagonal.
    @pl.when(ki * tk <= qi * tq + (tq - 1))
    def _():
        half = hd // 2
        # Fused RoPE: weights pre-permuted per head to [even | odd] layout,
        # rotation sign folded into the sin table -> pure rotate-half.
        q = q_ref[...].astype(jnp.float32)
        k = k_ref[...].astype(jnp.float32)
        q = q * cq_ref[...] + pltpu.roll(q, half, axis=1) * sq_ref[...]
        k = k * ck_ref[...] + pltpu.roll(k, half, axis=1) * sk_ref[...]

        s = lax.dot_general(q.astype(jnp.bfloat16), k.astype(jnp.bfloat16),
                            (((1,), (1,)), ((), ())),
                            preferred_element_type=jnp.float32)
        s = s * (1.0 / math.sqrt(hd))

        q_pos = lax.broadcasted_iota(jnp.int32, (tq, tk), 0) + qi * tq
        k_pos = lax.broadcasted_iota(jnp.int32, (tq, tk), 1) + ki * tk
        s = jnp.where(q_pos >= k_pos, s, -1e30)

        m_prev = m_scr[...]
        m_new = jnp.maximum(m_prev, s.max(axis=-1, keepdims=True))
        alpha = jnp.exp(m_prev - m_new)
        p = jnp.exp(s - m_new)
        l_scr[...] = alpha * l_scr[...] + p.sum(axis=-1, keepdims=True)
        acc_scr[...] = alpha * acc_scr[...] + jnp.dot(
            p.astype(jnp.bfloat16), v_ref[...],
            preferred_element_type=jnp.float32)
        m_scr[...] = m_new

    @pl.when(ki == pl.num_programs(3) - 1)
    def _():
        o_ref[...] = (acc_scr[...] *
                      pl.reciprocal(l_scr[...], approx=True)).astype(o_ref.dtype)


def flash_attention(qkv, cos, sin, *, batch, seq, n_heads, n_kv_heads,
                    head_dim, tq=128, tk=128):
    """qkv: (B*S, (H + 2*Hkv)*hd) bf16 (fused projection output, q/k permuted);
    cos/sin: (S, hd) f32 RoPE tables.  Returns (B*S, H*hd) bf16."""
    n_rep = n_heads // n_kv_heads
    tq, tk = _fit(seq, tq), _fit(seq, tk)
    nq, nk = seq // tq, seq // tk

    q_map = lambda b, h, qi, ki: (b * nq + qi, h)
    k_map = lambda b, h, qi, ki: (b * nk + ki, n_heads + h // n_rep)
    v_map = lambda b, h, qi, ki: (b * nk + ki, n_heads + n_kv_heads + h // n_rep)
    cq_map = lambda b, h, qi, ki: (qi, 0)
    ck_map = lambda b, h, qi, ki: (ki, 0)
    o_map = lambda b, h, qi, ki: (b * nq + qi, h)

    return pl.pallas_call(
        _flash_attn_kernel,
        out_shape=jax.ShapeDtypeStruct((batch * seq, n_heads * head_dim),
                                       jnp.bfloat16),
        grid_spec=pltpu.PrefetchScalarGridSpec(
            num_scalar_prefetch=0,
            grid=(batch, n_heads, nq, nk),
            in_specs=[pl.BlockSpec((tq, head_dim), q_map),
                      pl.BlockSpec((tk, head_dim), k_map),
                      pl.BlockSpec((tk, head_dim), v_map),
                      pl.BlockSpec((tq, head_dim), cq_map),
                      pl.BlockSpec((tq, head_dim), cq_map),
                      pl.BlockSpec((tk, head_dim), ck_map),
                      pl.BlockSpec((tk, head_dim), ck_map)],
            out_specs=pl.BlockSpec((tq, head_dim), o_map),
            scratch_shapes=[pltpu.VMEM((tq, 1), jnp.float32),
                            pltpu.VMEM((tq, 1), jnp.float32),
                            pltpu.VMEM((tq, head_dim), jnp.float32)],
        ),
        compiler_params=pltpu.CompilerParams(
            dimension_semantics=("parallel", "parallel", "parallel",
                                 "arbitrary"),
            vmem_limit_bytes=48 * 1024 * 1024,
        ),
    )(qkv, qkv, qkv, cos, sin, cos, sin)


# --------------------------------------------------------------------------
# Host-side helpers + full forward.
# --------------------------------------------------------------------------
def _permute_pairs(w, n_heads, head_dim):
    """Reorder output columns of a (in, H*hd) weight per head from interleaved
    (x0,x1,x2,x3,...) to (x0,x2,... | x1,x3,...)."""
    in_dim = w.shape[0]
    w = w.reshape(in_dim, n_heads, head_dim // 2, 2)
    w = jnp.concatenate([w[..., 0], w[..., 1]], axis=-1)
    return w.reshape(in_dim, n_heads * head_dim)


def _rope_tables(seq, head_dim, theta):
    half = head_dim // 2
    freqs = 1.0 / (theta ** (jnp.arange(half, dtype=jnp.float32) * 2.0 / head_dim))
    ang = jnp.outer(jnp.arange(seq, dtype=jnp.float32), freqs)      # (S, hd/2)
    cos = jnp.concatenate([jnp.cos(ang), jnp.cos(ang)], axis=-1)    # (S, hd)
    sin = jnp.concatenate([-jnp.sin(ang), jnp.sin(ang)], axis=-1)   # sign folded
    return cos, sin


def attention_forward(x, wq, wk, wv, wo, *, n_heads, n_kv_heads=None,
                      rope_theta=10000.0):
    """x: (B, S, dim).  Weights stored as (in_features, out_features)
    (i.e. PyTorch weight.T).  No-cache prefill path with causal mask."""
    if n_kv_heads is None:
        n_kv_heads = n_heads
    B, S, dim = x.shape
    head_dim = dim // n_heads
    assert head_dim % 128 == 0, "head_dim must be a multiple of the 128 lanes"
    assert S % 8 == 0

    # Fuse q/k/v into one projection; pre-permute q/k columns for in-kernel RoPE.
    wq_p = _permute_pairs(wq, n_heads, head_dim)
    wk_p = _permute_pairs(wk, n_kv_heads, head_dim)
    wqkv = jnp.concatenate([wq_p, wk_p, wv], axis=1)

    x2d = x.reshape(B * S, dim)
    qkv = matmul_bf16(x2d, wqkv, out_dtype=jnp.bfloat16)  # (B*S, (H+2Hkv)*hd)

    cos, sin = _rope_tables(S, head_dim, rope_theta)
    attn = flash_attention(qkv, cos, sin, batch=B, seq=S, n_heads=n_heads,
                           n_kv_heads=n_kv_heads, head_dim=head_dim)

    out = matmul_bf16(attn, wo, out_dtype=x.dtype)         # (B*S, dim)
    return out.reshape(B, S, dim)


# --------------------------------------------------------------------------
# Pure-JAX reference (PyTorch-equivalent math, interleaved RoPE, SDPA causal).
# --------------------------------------------------------------------------
def _reference_forward(x, wq, wk, wv, wo, n_heads, n_kv_heads, theta=10000.0):
    B, S, dim = x.shape
    hd = dim // n_heads
    f32 = jnp.float32
    bf = lambda a: a.astype(jnp.bfloat16).astype(f32)   # mirror kernel casts

    x2d = bf(x).reshape(B * S, dim)
    q = bf(x2d @ bf(wq)).reshape(B, S, n_heads, hd)
    k = bf(x2d @ bf(wk)).reshape(B, S, n_kv_heads, hd)
    v = bf(x2d @ bf(wv)).reshape(B, S, n_kv_heads, hd)

    half = hd // 2
    freqs = 1.0 / (theta ** (jnp.arange(half, dtype=f32) * 2.0 / hd))
    ang = jnp.outer(jnp.arange(S, dtype=f32), freqs)
    cos = jnp.cos(ang)[None, :, None, :]
    sin = jnp.sin(ang)[None, :, None, :]

    def rope(t):
        tr, ti = t[..., 0::2], t[..., 1::2]
        rr = tr * cos - ti * sin
        ri = tr * sin + ti * cos
        return jnp.stack([rr, ri], axis=-1).reshape(t.shape)

    q, k = bf(rope(q)), bf(rope(k))

    n_rep = n_heads // n_kv_heads
    k = jnp.repeat(k, n_rep, axis=2)
    v = jnp.repeat(v, n_rep, axis=2)

    s = jnp.einsum('bqhd,bkhd->bhqk', q, k) / math.sqrt(hd)
    causal = jnp.arange(S)[:, None] >= jnp.arange(S)[None, :]
    s = jnp.where(causal[None, None], s, -jnp.inf)
    p = jax.nn.softmax(s, axis=-1)
    o = bf(jnp.einsum('bhqk,bkhd->bqhd', p, v)).reshape(B * S, n_heads * hd)
    return (o @ bf(wo)).reshape(B, S, dim)


def _kaiming_uniform(key, fan_in, shape, dtype=jnp.float32):
    # nn.init.kaiming_uniform_(a=sqrt(5)) -> bound = 1/sqrt(fan_in)
    bound = 1.0 / math.sqrt(fan_in)
    return jax.random.uniform(key, shape, dtype, minval=-bound, maxval=bound)


if __name__ == "__main__":
    # Small config consistent with ModelArgs (model-parallel world size 1).
    batch, seq = 2, 256
    dim, n_heads, n_kv_heads = 256, 2, 2
    head_dim = dim // n_heads

    key = jax.random.PRNGKey(0)
    kx, kq, kk, kv, ko = jax.random.split(key, 5)
    x = jax.random.normal(kx, (batch, seq, dim), jnp.float32)
    # Weights stored as (in_features, out_features) == PyTorch weight.T
    wq = _kaiming_uniform(kq, dim, (dim, n_heads * head_dim))
    wk = _kaiming_uniform(kk, dim, (dim, n_kv_heads * head_dim))
    wv = _kaiming_uniform(kv, dim, (dim, n_kv_heads * head_dim))
    wo = _kaiming_uniform(ko, n_heads * head_dim, (n_heads * head_dim, dim))

    out = attention_forward(x, wq, wk, wv, wo, n_heads=n_heads,
                            n_kv_heads=n_kv_heads)
    jax.block_until_ready(out)
    assert out.shape == (batch, seq, dim)

    ref = _reference_forward(x, wq, wk, wv, wo, n_heads, n_kv_heads)
    err = float(jnp.max(jnp.abs(out - ref)))
    assert jnp.allclose(out, ref, atol=2e-2, rtol=2e-2), f"mismatch, max err={err}"

    print("KERNEL_OK")
</pallas_src>

<mosaic_0001>
module attributes {stable_mosaic.version = 11 : i64} {
  func.func @_matmul_kernel(%arg0: i32, %arg1: i32, %arg2: i32, %arg3: memref<128x256xbf16, #tpu.memory_space<vmem>>, %arg4: memref<256x768xbf16, #tpu.memory_space<vmem>>, %arg5: memref<128x768xbf16, #tpu.memory_space<vmem>>, %arg6: memref<128x768xf32, #tpu.memory_space<vmem>>) attributes {dimension_semantics = [#tpu.dimension_semantics<parallel>, #tpu.dimension_semantics<parallel>, #tpu.dimension_semantics<arbitrary>], iteration_bounds = array<i64: 4, 1, 1>, scalar_prefetch = 0 : i64, scratch_operands = 1 : i64, tpu.core_type = #tpu.core_type<tc>, window_params = [{transform_indices = @transform_0, window_bounds = array<i64: 128, 256>}, {transform_indices = @transform_1, window_bounds = array<i64: 256, 768>}, {transform_indices = @transform_2, window_bounds = array<i64: 128, 768>}]} {
    %c0_i32 = arith.constant 0 : i32
    %0 = arith.cmpi eq, %arg2, %c0_i32 : i32
    %1 = arith.extui %0 : i1 to i32
    %c0_i32_0 = arith.constant 0 : i32
    %2 = arith.cmpi ne, %1, %c0_i32_0 : i32
    scf.if %2 {
      %cst_10 = arith.constant 0.000000e+00 : f32
      %12 = vector.broadcast %cst_10 : f32 to vector<128x768xf32>
      %c0_11 = arith.constant 0 : index
      %c0_12 = arith.constant 0 : index
      %13 = vector.load %arg6[%c0_11, %c0_12] : memref<128x768xf32, #tpu.memory_space<vmem>>, vector<128x768xf32>
      tpu.vector_store %arg6[%c0_11, %c0_12], %12 {strides = array<i32>} : memref<128x768xf32, #tpu.memory_space<vmem>>, vector<128x768xf32>,
    } else {
    }
    %c0 = arith.constant 0 : index
    %c0_1 = arith.constant 0 : index
    %3 = vector.load %arg6[%c0, %c0_1] : memref<128x768xf32, #tpu.memory_space<vmem>>, vector<128x768xf32>
    %c0_2 = arith.constant 0 : index
    %c0_3 = arith.constant 0 : index
    %4 = vector.load %arg3[%c0_2, %c0_3] : memref<128x256xbf16, #tpu.memory_space<vmem>>, vector<128x256xbf16>
    %c0_4 = arith.constant 0 : index
    %c0_5 = arith.constant 0 : index
    %5 = vector.load %arg4[%c0_4, %c0_5] : memref<256x768xbf16, #tpu.memory_space<vmem>>, vector<256x768xbf16>
    %cst = arith.constant dense<0.000000e+00> : vector<128x768xf32>
    %6 = tpu.matmul %4, %5, %cst {dimension_numbers = #tpu.dot_dimension_numbers<[1], [0], [0], [1], [0, 0, 1, 1], [], []>} : vector<128x256xbf16>, vector<256x768xbf16>, vector<128x768xf32> -> vector<128x768xf32>
    %7 = arith.addf %3, %6 : vector<128x768xf32>
    %c0_6 = arith.constant 0 : index
    %c0_7 = arith.constant 0 : index
    %8 = vector.load %arg6[%c0_6, %c0_7] : memref<128x768xf32, #tpu.memory_space<vmem>>, vector<128x768xf32>
    tpu.vector_store %arg6[%c0_6, %c0_7], %7 {strides = array<i32>} : memref<128x768xf32, #tpu.memory_space<vmem>>, vector<128x768xf32>,
    %c0_i32_8 = arith.constant 0 : i32
    %9 = arith.cmpi eq, %arg2, %c0_i32_8 : i32
    %10 = arith.extui %9 : i1 to i32
    %c0_i32_9 = arith.constant 0 : i32
    %11 = arith.cmpi ne, %10, %c0_i32_9 : i32
    scf.if %11 {
      %c0_10 = arith.constant 0 : index
      %c0_11 = arith.constant 0 : index
      %12 = vector.load %arg6[%c0_10, %c0_11] : memref<128x768xf32, #tpu.memory_space<vmem>>, vector<128x768xf32>
      %13 = arith.truncf %12 : vector<128x768xf32> to vector<128x768xbf16>
      %c0_12 = arith.constant 0 : index
      %c0_13 = arith.constant 0 : index
      %14 = vector.load %arg5[%c0_12, %c0_13] : memref<128x768xbf16, #tpu.memory_space<vmem>>, vector<128x768xbf16>
      tpu.vector_store %arg5[%c0_12, %c0_13], %13 {strides = array<i32>} : memref<128x768xbf16, #tpu.memory_space<vmem>>, vector<128x768xbf16>,
    } else {
    }
    return
  }
  func.func @transform_0(%arg0: i32, %arg1: i32, %arg2: i32) -> (i32, i32) {
    %c0_i32 = arith.constant 0 : i32
    return %arg0, %arg2 : i32, i32
  }
  func.func @transform_1(%arg0: i32, %arg1: i32, %arg2: i32) -> (i32, i32) {
    %c0_i32 = arith.constant 0 : i32
    return %arg2, %arg1 : i32, i32
  }
  func.func @transform_2(%arg0: i32, %arg1: i32, %arg2: i32) -> (i32, i32) {
    %c0_i32 = arith.constant 0 : i32
    return %arg0, %arg1 : i32, i32
  }
}

</mosaic_0001>

<bundles_post_ra>
// kernel: tpu_custom_call.1
= control target key start
LH: loop header
LB: loop body
LE: loop exit
PB: predicated region body
PF: predicated region fallthrough
CT: control target
= control target key end

     0   :  { %7 = vsyncpa [#allocation4], 0  ;;  %s3198_s0 = inlined_call_operand.hbm [shape: bf16[512,256], index: 0, kind: input, shape index: {}]   ;;  %s3199_s1 = inlined_call_operand.hbm [shape: bf16[256,768], index: 1, kind: input, shape index: {}]   ;;  %s3200_s2 = inlined_call_operand.hbm [shape: bf16[512,768], index: 2, kind: output, shape index: {}]  }
   0x1   :  { %9 = vsyncpa [#allocation4 + $0x1], 0 }
   0x2   :  { %10 = vsyncpa [#allocation7], 0 }
   0x3   :  { %11 = vsyncpa [#allocation5], 0 }
   0x4   :  { %13 = vsyncpa [#allocation5 + $0x1], 0  ;;  %s2856_s9 = smov 0   ;;  %s2858_s10 = smov 0  }
   0x5   :  { %s2860_s11 = smov 0   ;;  %s2862_s12 = smov 0  }
   0x6   :  { %s2864_s13 = smov 0   ;;  %s2866_s14 = smov 0  }
   0x7 LB: > { %s2178_s15 = sadd.s32 4294967295, %s2830_s14   ;;  %s2179_s16 = sadd.s32 4294967294, %s2830_s14   ;;  %s2830_s14 = sphi %s2866_s14, %s19_s14   ;;  %s2826_s13 = sphi %s2864_s13, %s3223_s13   ;;  %s2822_s12 = sphi %s2862_s12, %s3222_s12   ;;  %s2818_s11 = sphi %s2860_s11, %s3221_s11   ;;  %s2814_s10 = sphi %s2858_s10, %s3220_s10   ;;  %s2810_s9 = sphi %s2856_s9, %s3219_s9  }
   0x8   : > { %p60_p0 = scmp.ne.s32.totalorder %s2814_s10, %s2810_s9  ;;  %p2890_p1 = scmp.eq.s32.totalorder %s2178_s15, 0 }
   0x9   : > { %p2894_p2 = scmp.eq.s32.totalorder %s2178_s15, 3  ;;  %p120_p3 = scmp.eq.s32.totalorder %s2179_s16, 3 }
   0xa   : > { %s3205_s17 = scalar_select %p2890_p1, 1, 0 }
   0xb   : > { %s3206_s18 = scalar_select %p2894_p2, 1, 0 }
   0xc   : > { %p2900_p4 = por %p2890_p1, %p60_p0  ;;  %p2180_p5 = scmp.ge.s32.totalorder %s2830_s14, 1 }
   0xd   : > { %p2905_p6 = por %p120_p3, %p60_p0  ;;  %p127_p7 = scmp.lt.s32.totalorder %s2830_s14, 5 }
   0xe   : > { %s3207_s19 = scalar_select %p2900_p4, 1, 0 }
   0xf   : > { %s3208_s20 = scalar_select %p2905_p6, 1, 0 }
  0x10   : > { %p2910_p8 = pnand %p2180_p5, %p127_p7  ;;  %s2832_s22 = smov [#allocation6]  }
  0x11   : > { %s145_s23 = sshll.u32 %s2832_s22, 4  ;;  %s38_s25 = sadd.s32 1, %s2826_s13  ;;  %s146_s23 = int_to_ptr.vmem [resolvable:$true] %s145_s23 }
  0x12   : > { %s3209_s21 = scalar_select %p2910_p8, 1, 0 }
  0x13   : > { %p2447_p9 = pneg %p2910_p8  ;;  %s2686_s28 = scalar_lea.hbm %s3199_s1, 12288 }
  0x14   : > { %p2687_p11 = scmp.ne.s32.totalorder %s3199_s1, %s2686_s28  ;;  %p2693_p3 = scmp.lt.u32.totalorder %s2686_s28, %s3199_s1 }
  0x15   : > { %p2918_p10 = pnand %p2447_p9, %p2890_p1 }
  0x17   : > { %p2688_p12 = pneg %p2918_p10 }
  0x19   : > { %p2689_p13 = pnand %p2688_p12, %p2687_p11 }
  0x1b   : > { %p2690_p0 = pneg %p2689_p13 }
  0x1d   : > { %p2695_p5 = pnand %p2693_p3, %p2690_p0 }
  0x1f   : > { %2698 = shalt.err (!%p2695_p5)
}
  0x20   : > { %s2699_s5 = scalar_lea.vmem %s146_s23, 12288  ;;  %p2707_p1 = scmp.lt.s32.totalorder %s146_s23, %s146_s23 }
  0x21   : > { %p2700_p7 = scmp.ne.s32.totalorder %s146_s23, %s2699_s5  ;;  %p2708_p4 = scmp.lt.s32.totalorder %s2699_s5, %s2699_s5 }
  0x23   : > { %p2702_p9 = pnand %p2700_p7, %p2688_p12  ;;  %p2709_p8 = por %p2708_p4, %p2707_p1 }
  0x25   : > { %p2703_p6 = pneg %p2702_p9 }
  0x27   : > { %p2710_p2 = pnand %p2709_p8, %p2703_p6 }
  0x29   : > { %2713 = shalt.err (!%p2710_p2)
}
  0x2a   : > { %s2833_s6 = smov 384   ;;  %s2834_s7 = smov 24  }
  0x2b   : > { %2450 = dma.hbm_to_vmem [thread:$0]  (!%p2918_p10), %s3199_s1, 12288, %s146_s23, [#allocation7], %s2833_s6, %s2833_s6, %s2834_s7  }
  0x2c   : > { %p40_p1 = scmp.ge.s32.totalorder %s38_s25, 4  ;;  %s47_s16 = sadd.s32 1, %s2818_s11 }
  0x2d   : > { %p54_p2 = scmp.ne.s32.totalorder %s2818_s11, %s2814_s10  ;;  %p55_p4 = scmp.eq.s32.totalorder %s2830_s14, 0 }
  0x2e   : > { %s3225_s25 = smov (%p40_p1, %s38_s25), 0  ;;  %p3212_p8 = scmp.ne.s32.totalorder %s3206_s18, 0 }
  0x2f   : > { %p2945_p6 = por %p55_p4, %p54_p2  ;;  %s42_s24 = ssub.s32 %s2826_s13, %s3225_s25 }
  0x30   : > { %p2951_p11 = por %p3212_p8, %p54_p2  ;;  %p2460_p12 = scmp.lt.s32.totalorder %s2830_s14, 4 }
  0x31   : > { %p45_p10 = scmp.eq.s32.totalorder %s42_s24, 0  ;;  %s159_s23 = sand.u32 1, %s2818_s11  }
  0x32   : > { %s2183_s27 = sshll.u32 %s159_s23, 7  ;;  %s2356_s29 = sshll.u32 %s2826_s13, 11 }
  0x33   : > { %s2960_s28 = scalar_select %p45_p10, %s2818_s11, %s47_s16  }
  0x34   : > { %s2966_s4 = scalar_lea.hbm %s3198_s0, %s2356_s29  ;;  %s163_s18 = scalar_lea.vmem [#allocation3], %s2183_s27 }
  0x35   : > { %s173_s5 = sshll.u32 %s163_s18, 4  ;;  %p2972_p13 = pnand %p2460_p12, %p2945_p6  ;;  %s2968_s5 = int_to_ptr.vmem [resolvable:$true] %s173_s5 }
  0x36   : > { %s2976_s7 = scalar_lea.sflag [#allocation4], %s159_s23  ;;  %s2714_s8 = scalar_lea.hbm %s2966_s4, 2048 }
  0x37   : > { %p2715_p0 = scmp.ne.s32.totalorder %s2966_s4, %s2714_s8  ;;  %p2716_p3 = pneg %p2972_p13 }
  0x38   : > { %s2719_s22 = scalar_lea.hbm %s3198_s0, 8192  ;;  %p2720_p9 = scmp.lt.u32.totalorder %s2966_s4, %s3198_s0 }
  0x39   : > { %p2717_p5 = pnand %p2716_p3, %p2715_p0  ;;  %p2721_p1 = scmp.lt.u32.totalorder %s2719_s22, %s2714_s8 }
  0x3a   : > { %p2723_p4 = scmp.lt.u32.totalorder %s2714_s8, %s2966_s4 }
  0x3b   : > { %p2718_p7 = pneg %p2717_p5  ;;  %p2722_p2 = por %p2721_p1, %p2720_p9 }
  0x3d   : > { %p2724_p6 = por %p2723_p4, %p2722_p2 }
  0x3f   : > { %p2725_p8 = pnand %p2724_p6, %p2718_p7 }
  0x41   : > { %2728 = shalt.err (!%p2725_p8)
}
  0x42   : > { %s2729_s23 = scalar_lea.vmem %s2968_s5, 2048  ;;  %s2835_s29 = smov [#allocation3]  }
  0x43   : > { %p2730_p12 = scmp.ne.s32.totalorder %s2968_s5, %s2729_s23  ;;  %s2734_s30 = sshll.u32 %s2835_s29, 4  ;;  %s2735_s30 = int_to_ptr.vmem [resolvable:$false] %s2734_s30 }
  0x44   : > { %s2736_s3 = scalar_lea.vmem %s2735_s30, 4096  ;;  %p2737_p5 = scmp.lt.s32.totalorder %s2968_s5, %s2735_s30 }
  0x45   : > { %p2732_p10 = pnand %p2730_p12, %p2716_p3  ;;  %p2738_p9 = scmp.lt.s32.totalorder %s2736_s3, %s2729_s23 }
  0x47   : > { %p2733_p0 = pneg %p2732_p10  ;;  %p2739_p1 = por %p2738_p9, %p2737_p5 }
  0x49   : > { %p2740_p2 = pnand %p2739_p1, %p2733_p0 }
  0x4b   : > { %2743 = shalt.err (!%p2740_p2)
}
  0x4c   : > { %s2836_s18 = smov 128   ;;  %s2837_s8 = smov 8  }
  0x4d   : > { %2454 = dma.hbm_to_vmem [thread:$0]  (!%p2972_p13), %s2966_s4, 2048, %s2968_s5, %s2976_s7, %s2836_s18, %s2836_s18, %s2837_s8  }
  0x4e   : > { %p3215_p3 = scmp.ne.s32.totalorder %s3209_s21, 0 }
  0x4f   : > { %s3007_s15 = sand.u32 (!%p3215_p3), 1, %s2814_s10   ;;  %p3216_p7 = scmp.ne.s32.totalorder (!%p3215_p3), %s3207_s19, 0 }
  0x50   : > { %185 = sbr.rel (%p3215_p3) target bundleno = 477 (0x1dd), region = 28  ;;  %s2188_s16 = sshll.u32 (!%p3215_p3), %s3007_s15, 7 }
  0x51   : > { %s188_s22 = scalar_lea.sflag (!%p3215_p3), [#allocation4], %s3007_s15  ;;  %s3011_s24 = scalar_lea.vmem (!%p3215_p3), [#allocation3], %s2188_s16 }
  0x57   : > { %2797 = dma.done.wait (%p3216_p7), %s188_s22, 2048  }
  0x58   : > { %2799 = vsyncadd (%p3216_p7), %s188_s22, 4294965248  ;;  %p3217_p13 = scmp.ne.s32.totalorder %s3205_s17, 0 }
  0x5a   : > { %2801 = dma.done.wait (%p3217_p13), [#allocation7], 12288  }
  0x5b   : > { %2803 = vsyncadd (%p3217_p13), [#allocation7], 4294955008  ;;  %v2518_v0 = vld [vmem:[#allocation6 + $0x4] ss:$24 sps:$4 sm:$0xff]   ;;  %v2522_v2 = vld [vmem:[#allocation6] ss:$24 sps:$4 sm:$0xff]  }
  0x5c   : > { %v2520_v1 = vld [vmem:[#allocation6 + $0xc] ss:$24 sps:$4 sm:$0xff]   ;;  %1090 = vmatprep.subr.bf16.mxu0 %v2518_v0  ;;  %v2523_v3 = vld [vmem:[#allocation6 + $0x8] ss:$24 sps:$4 sm:$0xff]   ;;  %v2526_v5 = vld [vmem:[#allocation6 + $0x3c] ss:$24 sps:$4 sm:$0xff]  }
  0x5d   : > { %1203 = vmatprep.subr.bf16.mxu1 %v2520_v1  ;;  %v2524_v4 = vld [vmem:[#allocation6 + $0x34] ss:$24 sps:$4 sm:$0xff]   ;;  %1091 = vmatpush1.bf16.msra.mxu0 %v2522_v2  ;;  %v2528_v6 = vld [vmem:[#allocation6 + $0x30] ss:$24 sps:$4 sm:$0xff]   ;;  %v2530_v8 = vld [vmem:[#allocation6 + $0x64] ss:$24 sps:$4 sm:$0xff]  }
  0x5e   : > { %1204 = vmatpush1.bf16.msra.mxu1 %v2523_v3  ;;  %1092 = vmatprep.subr.bf16.mxu0 %v2524_v4  ;;  %v2529_v7 = vld [vmem:[#allocation6 + $0x38] ss:$24 sps:$4 sm:$0xff]   ;;  %v2532_v9 = vld [vmem:[#allocation6 + $0x6c] ss:$24 sps:$4 sm:$0xff]   ;;  %v2535_v11 = vld [vmem:[#allocation6 + $0x68] ss:$24 sps:$4 sm:$0xff]  }
  0x5f   : > { %1205 = vmatprep.subr.bf16.mxu1 %v2526_v5  ;;  %v2534_v10 = vld [vmem:[#allocation6 + $0x60] ss:$24 sps:$4 sm:$0xff]   ;;  %v2536_v12 = vld [vmem:[#allocation6 + $0x94] ss:$24 sps:$4 sm:$0xff]   ;;  %v2540_v14 = vld [vmem:[#allocation6 + $0x90] ss:$24 sps:$4 sm:$0xff]  }
  0x60   : > { %v2538_v13 = vld [vmem:[#allocation6 + $0x9c] ss:$24 sps:$4 sm:$0xff]   ;;  %v2541_v15 = vld [vmem:[#allocation6 + $0x98] ss:$24 sps:$4 sm:$0xff]   ;;  %v2544_v17 = vld [vmem:[#allocation6 + $0xcc] ss:$24 sps:$4 sm:$0xff]  }
  0x61   : > { %1093 = vmatpush1.bf16.msra.mxu0 %v2528_v6  ;;  %v2542_v16 = vld [vmem:[#allocation6 + $0xc4] ss:$24 sps:$4 sm:$0xff]   ;;  %v2546_v18 = vld [vmem:[#allocation6 + $0xc0] ss:$24 sps:$4 sm:$0xff]   ;;  %v2548_v20 = vld [vmem:[#allocation6 + $0xf4] ss:$24 sps:$4 sm:$0xff]  }
  0x62   : > { %1206 = vmatpush1.bf16.msra.mxu1 %v2529_v7  ;;  %1094 = vmatprep.subr.bf16.mxu0 %v2530_v8  ;;  %v2547_v19 = vld [vmem:[#allocation6 + $0xc8] ss:$24 sps:$4 sm:$0xff]   ;;  %v2550_v21 = vld [vmem:[#allocation6 + $0xfc] ss:$24 sps:$4 sm:$0xff]   ;;  %v2553_v23 = vld [vmem:[#allocation6 + $0xf8] ss:$24 sps:$4 sm:$0xff]  }
  0x63   : > { %1207 = vmatprep.subr.bf16.mxu1 %v2532_v9  ;;  %v2552_v22 = vld [vmem:[#allocation6 + $0xf0] ss:$24 sps:$4 sm:$0xff]   ;;  %v2554_v24 = vld [vmem:[#allocation6 + $0x124] ss:$24 sps:$4 sm:$0xff]   ;;  %v2558_v26 = vld [vmem:[#allocation6 + $0x120] ss:$24 sps:$4 sm:$0xff]  }
  0x64   : > { %v2556_v25 = vld [vmem:[#allocation6 + $0x12c] ss:$24 sps:$4 sm:$0xff]   ;;  %v2559_v27 = vld [vmem:[#allocation6 + $0x128] ss:$24 sps:$4 sm:$0xff]   ;;  %v2562_v29 = vld [vmem:[#allocation6 + $0x15c] ss:$24 sps:$4 sm:$0xff]  }
  0x65   : > { %1095 = vmatpush1.bf16.msra.mxu0 %v2534_v10  ;;  %v2560_v28 = vld [vmem:[#allocation6 + $0x154] ss:$24 sps:$4 sm:$0xff]   ;;  %v2564_v30 = vld [vmem:[#allocation6 + $0x150] ss:$24 sps:$4 sm:$0xff]   ;;  %v2566_v32 = vld [vmem:[#allocation6 + $0x184] ss:$24 sps:$4 sm:$0xff]  }
  0x66   : > { %1208 = vmatpush1.bf16.msra.mxu1 %v2535_v11  ;;  %1096 = vmatprep.subr.bf16.mxu0 %v2536_v12  ;;  %v2565_v31 = vld [vmem:[#allocation6 + $0x158] ss:$24 sps:$4 sm:$0xff]   ;;  %v2568_v33 = vld [vmem:[#allocation6 + $0x18c] ss:$24 sps:$4 sm:$0xff]   ;;  %v2571_v35 = vld [vmem:[#allocation6 + $0x188] ss:$24 sps:$4 sm:$0xff]  }
  0x67   : > { %1209 = vmatprep.subr.bf16.mxu1 %v2538_v13  ;;  %v2570_v34 = vld [vmem:[#allocation6 + $0x180] ss:$24 sps:$4 sm:$0xff]   ;;  %v2572_v36 = vld [vmem:[#allocation6 + $0x1b4] ss:$24 sps:$4 sm:$0xff]   ;;  %v2576_v38 = vld [vmem:[#allocation6 + $0x1b0] ss:$24 sps:$4 sm:$0xff]  }
  0x68   : > { %v2574_v37 = vld [vmem:[#allocation6 + $0x1bc] ss:$24 sps:$4 sm:$0xff]   ;;  %v2577_v39 = vld [vmem:[#allocation6 + $0x1b8] ss:$24 sps:$4 sm:$0xff]   ;;  %v2580_v41 = vld [vmem:[#allocation6 + $0x1ec] ss:$24 sps:$4 sm:$0xff]  }
  0x69   : > { %1097 = vmatpush1.bf16.msra.mxu0 %v2540_v14  ;;  %v2578_v40 = vld [vmem:[#allocation6 + $0x1e4] ss:$24 sps:$4 sm:$0xff]   ;;  %v2582_v42 = vld [vmem:[#allocation6 + $0x1e0] ss:$24 sps:$4 sm:$0xff]   ;;  %v2584_v44 = vld [vmem:[#allocation6 + $0x214] ss:$24 sps:$4 sm:$0xff]  }
  0x6a   : > { %1210 = vmatpush1.bf16.msra.mxu1 %v2541_v15  ;;  %1098 = vmatprep.subr.bf16.mxu0 %v2542_v16  ;;  %v2583_v43 = vld [vmem:[#allocation6 + $0x1e8] ss:$24 sps:$4 sm:$0xff]   ;;  %v2586_v45 = vld [vmem:[#allocation6 + $0x21c] ss:$24 sps:$4 sm:$0xff]   ;;  %v2589_v47 = vld [vmem:[#allocation6 + $0x218] ss:$24 sps:$4 sm:$0xff]  }
  0x6b   : > { %1211 = vmatprep.subr.bf16.mxu1 %v2544_v17  ;;  %v2588_v46 = vld [vmem:[#allocation6 + $0x210] ss:$24 sps:$4 sm:$0xff]   ;;  %v3022_v48 = vld [vmem:[%s3011_s24 + $0x4] ss:$8 sps:$4 sm:$0xff]   ;;  %v2594_v51 = vld [vmem:[#allocation6 + $0x240] ss:$24 sps:$4 sm:$0xff]  }
  0x6c   : > { %v2590_v49 = vld [vmem:[#allocation6 + $0x244] ss:$24 sps:$4 sm:$0xff]   ;;  %1122 = vmatprep.mubr.bf16.mxu0 %v3022_v48  ;;  %1235 = vmatprep.mubr.bf16.mxu1 %v3022_v48  ;;  %v2595_v52 = vld [vmem:[#allocation6 + $0x248] ss:$24 sps:$4 sm:$0xff]   ;;  %v2596_v53 = vld [vmem:[#allocation6 + $0x274] ss:$24 sps:$4 sm:$0xff]  }
  0x6d   : > { %1099 = vmatpush1.bf16.msra.mxu0 %v2546_v18  ;;  %v2592_v50 = vld [vmem:[#allocation6 + $0x24c] ss:$24 sps:$4 sm:$0xff]   ;;  %v2598_v54 = vld [vmem:[#allocation6 + $0x27c] ss:$24 sps:$4 sm:$0xff]   ;;  %v2600_v55 = vld [vmem:[#allocation6 + $0x270] ss:$24 sps:$4 sm:$0xff]  }
  0x6e   : > { %1212 = vmatpush1.bf16.msra.mxu1 %v2547_v19  ;;  %1100 = vmatprep.subr.bf16.mxu0 %v2548_v20  ;;  %v2601_v56 = vld [vmem:[#allocation6 + $0x278] ss:$24 sps:$4 sm:$0xff]   ;;  %v2602_v57 = vld [vmem:[#allocation6 + $0x2a4] ss:$24 sps:$4 sm:$0xff]   ;;  %v2607_v60 = vld [vmem:[#allocation6 + $0x2a8] ss:$24 sps:$4 sm:$0xff]  }
  0x6f   : > { %1213 = vmatprep.subr.bf16.mxu1 %v2550_v21  ;;  %v2604_v58 = vld [vmem:[#allocation6 + $0x2ac] ss:$24 sps:$4 sm:$0xff]   ;;  %v2606_v59 = vld [vmem:[#allocation6 + $0x2a0] ss:$24 sps:$4 sm:$0xff]   ;;  %v2610_v62 = vld [vmem:[#allocation6 + $0x2dc] ss:$24 sps:$4 sm:$0xff]  }
  0x70   : > { %v2608_v61 = vld [vmem:[#allocation6 + $0x2d4] ss:$24 sps:$4 sm:$0xff]   ;;  %v2612_v63 = vld [vmem:[#allocation6 + $0x2d0] ss:$24 sps:$4 sm:$0xff]   ;;  %v2622_v4 = vld [vmem:[#allocation6 + $0x44] ss:$24 sps:$4 sm:$0xff]  }
  0x71   : > { %1101 = vmatpush1.bf16.msra.mxu0 %v2552_v22  ;;  %v2613_v0 = vld [vmem:[#allocation6 + $0x2d8] ss:$24 sps:$4 sm:$0xff]   ;;  %v2619_v1 = vld [vmem:[#allocation6 + $0x14] ss:$24 sps:$4 sm:$0xff]   ;;  %v3027_v2 = vld [vmem:[%s3011_s24] ss:$8 sps:$4 sm:$0xff]  }
  0x72   : > { %1214 = vmatpush1.bf16.msra.mxu1 %v2553_v23  ;;  %1102 = vmatprep.subr.bf16.mxu0 %v2554_v24  ;;  %v2617_v3 = vld [vmem:[#allocation6 + $0x10] ss:$24 sps:$4 sm:$0xff]   ;;  %v3030_v5 = vld [vmem:[%s3011_s24 + $0x14] ss:$8 sps:$4 sm:$0xff]   ;;  %v2620_v6 = vld [vmem:[#allocation6 + $0x40] ss:$24 sps:$4 sm:$0xff]  }
  0x73   : > { %1215 = vmatprep.subr.bf16.mxu1 %v2556_v25  ;;  %v2628_v7 = vld [vmem:[#allocation6 + $0x74] ss:$24 sps:$4 sm:$0xff]   ;;  %v3037_v8 = vld [vmem:[%s3011_s24 + $0x10] ss:$8 sps:$4 sm:$0xff]   ;;  %v2631_v10 = vld [vmem:[#allocation6 + $0xa4] ss:$24 sps:$4 sm:$0xff]  }
  0x74   : > { %v2626_v9 = vld [vmem:[#allocation6 + $0x70] ss:$24 sps:$4 sm:$0xff]   ;;  %v3040_v11 = vld [vmem:[%s3011_s24 + $0x24] ss:$8 sps:$4 sm:$0xff]   ;;  %v2629_v12 = vld [vmem:[#allocation6 + $0xa0] ss:$24 sps:$4 sm:$0xff]  }
  0x75   : > { %1103 = vmatpush1.bf16.msra.mxu0 %v2558_v26  ;;  %v2637_v13 = vld [vmem:[#allocation6 + $0xd4] ss:$24 sps:$4 sm:$0xff]   ;;  %v3047_v14 = vld [vmem:[%s3011_s24 + $0x20] ss:$8 sps:$4 sm:$0xff]   ;;  %v2640_v16 = vld [vmem:[#allocation6 + $0x104] ss:$24 sps:$4 sm:$0xff]  }
  0x76   : > { %1216 = vmatpush1.bf16.msra.mxu1 %v2559_v27  ;;  %1104 = vmatprep.subr.bf16.mxu0 %v2560_v28  ;;  %v2635_v15 = vld [vmem:[#allocation6 + $0xd0] ss:$24 sps:$4 sm:$0xff]   ;;  %v3050_v17 = vld [vmem:[%s3011_s24 + $0x34] ss:$8 sps:$4 sm:$0xff]   ;;  %v2638_v18 = vld [vmem:[#allocation6 + $0x100] ss:$24 sps:$4 sm:$0xff]  }
  0x77   : > { %1217 = vmatprep.subr.bf16.mxu1 %v2562_v29  ;;  %v2646_v19 = vld [vmem:[#allocation6 + $0x134] ss:$24 sps:$4 sm:$0xff]   ;;  %v3057_v20 = vld [vmem:[%s3011_s24 + $0x30] ss:$8 sps:$4 sm:$0xff]   ;;  %v2649_v22 = vld [vmem:[#allocation6 + $0x164] ss:$24 sps:$4 sm:$0xff]  }
  0x78   : > { %v2644_v21 = vld [vmem:[#allocation6 + $0x130] ss:$24 sps:$4 sm:$0xff]   ;;  %v3060_v23 = vld [vmem:[%s3011_s24 + $0x44] ss:$8 sps:$4 sm:$0xff]   ;;  %v2647_v24 = vld [vmem:[#allocation6 + $0x160] ss:$24 sps:$4 sm:$0xff]  }
  0x79   : > { %1105 = vmatpush1.bf16.msra.mxu0 %v2564_v30  ;;  %v2655_v25 = vld [vmem:[#allocation6 + $0x194] ss:$24 sps:$4 sm:$0xff]   ;;  %v3067_v26 = vld [vmem:[%s3011_s24 + $0x40] ss:$8 sps:$4 sm:$0xff]   ;;  %v2658_v28 = vld [vmem:[#allocation6 + $0x1c4] ss:$24 sps:$4 sm:$0xff]  }
  0x7a   : > { %1218 = vmatpush1.bf16.msra.mxu1 %v2565_v31  ;;  %1106 = vmatprep.subr.bf16.mxu0 %v2566_v32  ;;  %v2653_v27 = vld [vmem:[#allocation6 + $0x190] ss:$24 sps:$4 sm:$0xff]   ;;  %v3070_v29 = vld [vmem:[%s3011_s24 + $0x54] ss:$8 sps:$4 sm:$0xff]   ;;  %v2656_v30 = vld [vmem:[#allocation6 + $0x1c0] ss:$24 sps:$4 sm:$0xff]  }
  0x7b   : > { %1219 = vmatprep.subr.bf16.mxu1 %v2568_v33  ;;  %v2664_v31 = vld [vmem:[#allocation6 + $0x1f4] ss:$24 sps:$4 sm:$0xff]   ;;  %v2661_v32 = vld [vmem:[%s3011_s24 + $0x50] ss:$8 sps:$4 sm:$0xff]   ;;  %s2437_s17 = smul.u32 384, %s3007_s15  ;;  %s2838_s23 = smov [#allocation8]  }
  0x7c   : > { %v2662_v33 = vld [vmem:[#allocation6 + $0x1f0] ss:$24 sps:$4 sm:$0xff]   ;;  %s2438_s21 = smul.u32 6144, %s2822_s12  ;;  %s2057_s12 = scalar_lea.sflag [#allocation5], %s3007_s15 }
  0x7d   : > { %1107 = vmatpush1.bf16.msra.mxu0 %v2570_v34  ;;  %v2667_v34 = vld [vmem:[#allocation6 + $0x224] ss:$24 sps:$4 sm:$0xff]   ;;  %s3093_s19 = scalar_lea.vmem [#allocation8], %s2437_s17  ;;  %s2748_s29 = sshll.u32 %s2838_s23, 4  ;;  %s2749_s29 = int_to_ptr.vmem [resolvable:$false] %s2748_s29 }
  0x7e   : > { %1220 = vmatpush1.bf16.msra.mxu1 %v2571_v35  ;;  %1108 = vmatprep.subr.bf16.mxu0 %v2572_v36  ;;  %v2668_v35 = vld [vmem:[%s3011_s24 + $0x64] ss:$8 sps:$4 sm:$0xff]   ;;  %v2665_v36 = vld [vmem:[#allocation6 + $0x220] ss:$24 sps:$4 sm:$0xff]   ;;  %s2073_s4 = sshll.u32 %s3093_s19, 4  ;;  %s3144_s7 = scalar_lea.hbm %s3200_s2, %s2438_s21  ;;  %s3146_s4 = int_to_ptr.vmem [resolvable:$true] %s2073_s4 }
  0x7f   : > { %1221 = vmatprep.subr.bf16.mxu1 %v2574_v37  ;;  %v2673_v37 = vld [vmem:[#allocation6 + $0x254] ss:$24 sps:$4 sm:$0xff]   ;;  %s2744_s27 = scalar_lea.vmem %s3146_s4, 6144  ;;  %s2750_s30 = scalar_lea.vmem %s2749_s29, 12288 }
  0x80   : > { %p2745_p4 = scmp.ne.s32.totalorder %s3146_s4, %s2744_s27  ;;  %p2751_p12 = scmp.lt.s32.totalorder %s3146_s4, %s2749_s29 }
  0x81   : > { %1109 = vmatpush1.bf16.msra.mxu0 %v2576_v38  ;;  %v2670_v38 = vld [vmem:[%s3011_s24 + $0x60] ss:$8 sps:$4 sm:$0xff]   ;;  %p2752_p10 = scmp.lt.s32.totalorder %s2750_s30, %s2744_s27 }
  0x82   : > { %1222 = vmatpush1.bf16.msra.mxu1 %v2577_v39  ;;  %1110 = vmatprep.subr.bf16.mxu0 %v2578_v40  ;;  %v2671_v39 = vld [vmem:[#allocation6 + $0x250] ss:$24 sps:$4 sm:$0xff]   ;;  %v2676_v40 = vld [vmem:[#allocation6 + $0x284] ss:$24 sps:$4 sm:$0xff]   ;;  %p2746_p6 = pnand %p2745_p4, %p2951_p11 }
  0x83   : > { %1223 = vmatprep.subr.bf16.mxu1 %v2580_v41  ;;  %v2677_v41 = vld [vmem:[%s3011_s24 + $0x74] ss:$8 sps:$4 sm:$0xff]   ;;  %p2753_p0 = por %p2752_p10, %p2751_p12 }
  0x84   : > { %p2747_p8 = pneg %p2746_p6 }
  0x85   : > { %1111 = vmatpush1.bf16.msra.mxu0 %v2582_v42  ;;  %v2674_v42 = vld [vmem:[#allocation6 + $0x280] ss:$24 sps:$4 sm:$0xff]  }
  0x86   : > { %1224 = vmatpush1.bf16.msra.mxu1 %v2583_v43  ;;  %1112 = vmatprep.subr.bf16.mxu0 %v2584_v44  ;;  %v2682_v43 = vld [vmem:[#allocation6 + $0x2b4] ss:$24 sps:$4 sm:$0xff]   ;;  %v2679_v44 = vld [vmem:[%s3011_s24 + $0x70] ss:$8 sps:$4 sm:$0xff]   ;;  %p2754_p5 = pnand %p2753_p0, %p2747_p8 }
  0x87   : > { %1225 = vmatprep.subr.bf16.mxu1 %v2586_v45  ;;  %v2680_v45 = vld [vmem:[#allocation6 + $0x2b0] ss:$24 sps:$4 sm:$0xff]  }
  0x89   : > { %1113 = vmatpush1.bf16.msra.mxu0 %v2588_v46  ;;  %v2685_v46 = vld [vmem:[#allocation6 + $0x2e4] ss:$24 sps:$4 sm:$0xff]  }
  0x8a   : > { %1226 = vmatpush1.bf16.msra.mxu1 %v2589_v47  ;;  %1114 = vmatprep.subr.bf16.mxu0 %v2590_v49  ;;  %v2683_v47 = vld [vmem:[#allocation6 + $0x2e0] ss:$24 sps:$4 sm:$0xff]  }
  0x8b   : > { %1227 = vmatprep.subr.bf16.mxu1 %v2592_v50 }
  0x8d   : > { %1115 = vmatpush1.bf16.msra.mxu0 %v2594_v51 }
  0x8e   : > { %1228 = vmatpush1.bf16.msra.mxu1 %v2595_v52  ;;  %1116 = vmatprep.subr.bf16.mxu0 %v2596_v53 }
  0x8f   : > { %1229 = vmatprep.subr.bf16.mxu1 %v2598_v54 }
  0x91   : > { %1117 = vmatpush1.bf16.msra.mxu0 %v2600_v55 }
  0x92   : > { %1230 = vmatpush1.bf16.msra.mxu1 %v2601_v56  ;;  %1118 = vmatprep.subr.bf16.mxu0 %v2602_v57 }
  0x93   : > { %1231 = vmatprep.subr.bf16.mxu1 %v2604_v58 }
  0x95   : > { %1119 = vmatpush1.bf16.msra.mxu0 %v2606_v59 }
  0x96   : > { %1232 = vmatpush1.bf16.msra.mxu1 %v2607_v60  ;;  %1120 = vmatprep.subr.bf16.mxu0 %v2608_v61 }
  0x97   : > { %1233 = vmatprep.subr.bf16.mxu1 %v2610_v62 }
  0x99   : > { %1121 = vmatpush1.bf16.msra.mxu0 %v2612_v63 }
  0x9a   : > { %1234 = vmatpush1.bf16.msra.mxu1 %v2613_v0  ;;  %1316 = vmatprep.subr.bf16.mxu0 %v2619_v1 }
  0x9b   : > { %2405 = vmatprep.subr.bf16.mxu1 %v2619_v1 }
  0x9c   : > { %1123 = vmatmul.mubr.bf16.vlgmr.msra.gmra.mrb[0].mxu0 %v3027_v2 }
  0x9d   : > { %1236 = vmatmul.mubr.bf16.vlgmr.msra.gmra.mrb[0].mxu1 %v3027_v2  ;;  %1317 = vmatpush1.bf16.msra.mxu0 %v2617_v3 }
  0x9e   : > { %2421 = vmatpush1.bf16.msra.mxu1 %v2617_v3  ;;  %1318 = vmatprep.subr.bf16.mxu0 %v2622_v4 }
  0x9f   : > { %2406 = vmatprep.subr.bf16.mxu1 %v2622_v4  ;;  %1132 = vmatprep.mubr.bf16.mxu0 %v3030_v5 }
  0xa0   : > { %1245 = vmatprep.mubr.bf16.mxu1 %v3030_v5 }
  0xa1   : > { %1319 = vmatpush1.bf16.msra.mxu0 %v2620_v6 }
  0xa2   : > { %2422 = vmatpush1.bf16.msra.mxu1 %v2620_v6  ;;  %1320 = vmatprep.subr.bf16.mxu0 %v2628_v7 }
  0xa3   : > { %2407 = vmatprep.subr.bf16.mxu1 %v2628_v7 }
  0xa4   : > { %1133 = vmatmul.mubr.bf16.gmra.mrb[4].mxu0 %v3037_v8 }
  0xa5   : > { %1246 = vmatmul.mubr.bf16.gmra.mrb[4].mxu1 %v3037_v8  ;;  %1321 = vmatpush1.bf16.msra.mxu0 %v2626_v9 }
  0xa6   : > { %2423 = vmatpush1.bf16.msra.mxu1 %v2626_v9  ;;  %1322 = vmatprep.subr.bf16.mxu0 %v2631_v10 }
  0xa7   : > { %2408 = vmatprep.subr.bf16.mxu1 %v2631_v10  ;;  %1142 = vmatprep.mubr.bf16.mxu0 %v3040_v11 }
  0xa8   : > { %1255 = vmatprep.mubr.bf16.mxu1 %v3040_v11 }
  0xa9   : > { %1323 = vmatpush1.bf16.msra.mxu0 %v2629_v12 }
  0xaa   : > { %2424 = vmatpush1.bf16.msra.mxu1 %v2629_v12  ;;  %1324 = vmatprep.subr.bf16.mxu0 %v2637_v13 }
  0xab   : > { %2409 = vmatprep.subr.bf16.mxu1 %v2637_v13 }
  0xac   : > { %1143 = vmatmul.mubr.bf16.gmra.mrb[8].mxu0 %v3047_v14 }
  0xad   : > { %1256 = vmatmul.mubr.bf16.gmra.mrb[8].mxu1 %v3047_v14  ;;  %1325 = vmatpush1.bf16.msra.mxu0 %v2635_v15 }
  0xae   : > { %2425 = vmatpush1.bf16.msra.mxu1 %v2635_v15  ;;  %1326 = vmatprep.subr.bf16.mxu0 %v2640_v16 }
  0xaf   : > { %2410 = vmatprep.subr.bf16.mxu1 %v2640_v16  ;;  %1152 = vmatprep.mubr.bf16.mxu0 %v3050_v17 }
  0xb0   : > { %1265 = vmatprep.mubr.bf16.mxu1 %v3050_v17 }
  0xb1   : > { %1327 = vmatpush1.bf16.msra.mxu0 %v2638_v18 }
  0xb2   : > { %2426 = vmatpush1.bf16.msra.mxu1 %v2638_v18  ;;  %1328 = vmatprep.subr.bf16.mxu0 %v2646_v19 }
  0xb3   : > { %2411 = vmatprep.subr.bf16.mxu1 %v2646_v19 }
  0xb4   : > { %1153 = vmatmul.mubr.bf16.gmra.mrb[12].mxu0 %v3057_v20 }
  0xb5   : > { %1266 = vmatmul.mubr.bf16.gmra.mrb[12].mxu1 %v3057_v20  ;;  %1329 = vmatpush1.bf16.msra.mxu0 %v2644_v21 }
  0xb6   : > { %2427 = vmatpush1.bf16.msra.mxu1 %v2644_v21  ;;  %1330 = vmatprep.subr.bf16.mxu0 %v2649_v22 }
  0xb7   : > { %2412 = vmatprep.subr.bf16.mxu1 %v2649_v22  ;;  %1162 = vmatprep.mubr.bf16.mxu0 %v3060_v23 }
  0xb8   : > { %1275 = vmatprep.mubr.bf16.mxu1 %v3060_v23 }
  0xb9   : > { %1331 = vmatpush1.bf16.msra.mxu0 %v2647_v24 }
  0xba   : > { %2428 = vmatpush1.bf16.msra.mxu1 %v2647_v24  ;;  %1332 = vmatprep.subr.bf16.mxu0 %v2655_v25 }
  0xbb   : > { %2413 = vmatprep.subr.bf16.mxu1 %v2655_v25 }
  0xbc   : > { %1163 = vmatmul.mubr.bf16.gmra.mrb[16].mxu0 %v3067_v26 }
  0xbd   : > { %1276 = vmatmul.mubr.bf16.gmra.mrb[16].mxu1 %v3067_v26  ;;  %1333 = vmatpush1.bf16.msra.mxu0 %v2653_v27 }
  0xbe   : > { %2429 = vmatpush1.bf16.msra.mxu1 %v2653_v27  ;;  %1334 = vmatprep.subr.bf16.mxu0 %v2658_v28 }
  0xbf   : > { %2414 = vmatprep.subr.bf16.mxu1 %v2658_v28  ;;  %1172 = vmatprep.mubr.bf16.mxu0 %v3070_v29 }
  0xc0   : > { %1285 = vmatprep.mubr.bf16.mxu1 %v3070_v29 }
  0xc1   : > { %1335 = vmatpush1.bf16.msra.mxu0 %v2656_v30 }
  0xc2   : > { %2430 = vmatpush1.bf16.msra.mxu1 %v2656_v30  ;;  %1336 = vmatprep.subr.bf16.mxu0 %v2664_v31 }
  0xc3   : > { %2415 = vmatprep.subr.bf16.mxu1 %v2664_v31 }
  0xc4   : > { %1173 = vmatmul.mubr.bf16.gmra.mrb[20].mxu0 %v2661_v32 }
  0xc5   : > { %1286 = vmatmul.mubr.bf16.gmra.mrb[20].mxu1 %v2661_v32  ;;  %1337 = vmatpush1.bf16.msra.mxu0 %v2662_v33 }
  0xc6   : > { %2431 = vmatpush1.bf16.msra.mxu1 %v2662_v33  ;;  %1338 = vmatprep.subr.bf16.mxu0 %v2667_v34 }
  0xc7   : > { %2416 = vmatprep.subr.bf16.mxu1 %v2667_v34  ;;  %1182 = vmatprep.mubr.bf16.mxu0 %v2668_v35 }
  0xc8   : > { %1295 = vmatprep.mubr.bf16.mxu1 %v2668_v35 }
  0xc9   : > { %1339 = vmatpush1.bf16.msra.mxu0 %v2665_v36 }
  0xca   : > { %2432 = vmatpush1.bf16.msra.mxu1 %v2665_v36  ;;  %1340 = vmatprep.subr.bf16.mxu0 %v2673_v37 }
  0xcb   : > { %2417 = vmatprep.subr.bf16.mxu1 %v2673_v37 }
  0xcc   : > { %1183 = vmatmul.mubr.bf16.gmra.mrb[24].mxu0 %v2670_v38 }
  0xcd   : > { %1296 = vmatmul.mubr.bf16.gmra.mrb[24].mxu1 %v2670_v38  ;;  %1341 = vmatpush1.bf16.msra.mxu0 %v2671_v39 }
  0xce   : > { %2433 = vmatpush1.bf16.msra.mxu1 %v2671_v39  ;;  %1342 = vmatprep.subr.bf16.mxu0 %v2676_v40 }
  0xcf   : > { %2418 = vmatprep.subr.bf16.mxu1 %v2676_v40  ;;  %1192 = vmatprep.mubr.bf16.mxu0 %v2677_v41 }
  0xd0   : > { %1305 = vmatprep.mubr.bf16.mxu1 %v2677_v41 }
  0xd1   : > { %1343 = vmatpush1.bf16.msra.mxu0 %v2674_v42 }
  0xd2   : > { %2434 = vmatpush1.bf16.msra.mxu1 %v2674_v42  ;;  %1344 = vmatprep.subr.bf16.mxu0 %v2682_v43 }
  0xd3   : > { %2419 = vmatprep.subr.bf16.mxu1 %v2682_v43 }
  0xd4   : > { %1193 = vmatmul.mubr.bf16.gmra.mrb[28].mxu0 %v2679_v44 }
  0xd5   : > { %1306 = vmatmul.mubr.bf16.gmra.mrb[28].mxu1 %v2679_v44  ;;  %1345 = vmatpush1.bf16.msra.mxu0 %v2680_v45 }
  0xd6   : > { %2435 = vmatpush1.bf16.msra.mxu1 %v2680_v45  ;;  %1346 = vmatprep.subr.bf16.mxu0 %v2685_v46 }
  0xd7   : > { %2420 = vmatprep.subr.bf16.mxu1 %v2685_v46  ;;  %1348 = vmatprep.mubr.bf16.mxu0 %v3022_v48 }
  0xd8   : > { %1388 = vmatprep.mubr.bf16.mxu1 %v3060_v23 }
  0xd9   : > { %1347 = vmatpush1.bf16.msra.mxu0 %v2683_v47 }
  0xda   : > { %2436 = vmatpush1.bf16.msra.mxu1 %v2683_v47 }
  0xdc   : > { %1349 = vmatmul.mubr.bf16.vlgmr.msra.gmra.mrb[32].mxu0 %v3027_v2 }
  0xdd   : > { %1389 = vmatmul.mubr.bf16.vlgmr.msra.gmra.mrb[32].mxu1 %v3067_v26  ;;  %1358 = vmatprep.mubr.bf16.mxu0 %v3030_v5 }
  0xde   : > { %1398 = vmatprep.mubr.bf16.mxu1 %v3070_v29 }
  0xe4   : > { %1359 = vmatmul.mubr.bf16.gmra.mrb[36].mxu0 %v3037_v8 }
  0xe5   : > { %1399 = vmatmul.mubr.bf16.gmra.mrb[36].mxu1 %v2661_v32  ;;  %1368 = vmatprep.mubr.bf16.mxu0 %v3040_v11 }
  0xe6   : > { %1408 = vmatprep.mubr.bf16.mxu1 %v2668_v35 }
  0xec   : > { %1369 = vmatmul.mubr.bf16.gmra.mrb[40].mxu0 %v3047_v14 }
  0xed   : > { %1409 = vmatmul.mubr.bf16.gmra.mrb[40].mxu1 %v2670_v38  ;;  %1378 = vmatprep.mubr.bf16.mxu0 %v3050_v17 }
  0xee   : > { %1418 = vmatprep.mubr.bf16.mxu1 %v2677_v41 }
  0xf4   : > { %1379 = vmatmul.mubr.bf16.gmra.mrb[44].mxu0 %v3057_v20 }
  0xf5   : > { %1419 = vmatmul.mubr.bf16.gmra.mrb[44].mxu1 %v2679_v44 }
 0x16f   : > { %v1124_v48 = vpop.f32.mrb[0].mxu0 }
 0x170   : > { %v1237_v49 = vpop.f32.mrb[0].mxu1  ;;  %v1126_v50 = vpop.f32.mrb[1].mxu0 }
 0x171   : > { %v1239_v51 = vpop.f32.mrb[1].mxu1  ;;  %v2357_v52 = vpack.c.bf16 %v1126_v50, %v1124_v48  ;;  %v1128_v54 = vpop.f32.mrb[2].mxu0 }
 0x172   : > { %v2358_v53 = vpack.c.bf16 %v1239_v51, %v1237_v49  ;;  %v1241_v55 = vpop.f32.mrb[2].mxu1  ;;  %v1130_v56 = vpop.f32.mrb[3].mxu0 }
 0x173   : > { %v1243_v57 = vpop.f32.mrb[3].mxu1  ;;  %2008 = vst [vmem:[%s3093_s19] sm:$0xff] %v2357_v52  ;;  %v2360_v58 = vpack.c.bf16 %v1130_v56, %v1128_v54 }
 0x174   : > { %2009 = vst [vmem:[%s3093_s19 + $0x8] sm:$0xff] %v2358_v53  ;;  %v2361_v59 = vpack.c.bf16 %v1243_v57, %v1241_v55 }
 0x175   : > { %2011 = vst [vmem:[%s3093_s19 + $0x18] sm:$0xff] %v2360_v58 }
 0x176   : > { %2012 = vst [vmem:[%s3093_s19 + $0x20] sm:$0xff] %v2361_v59 }
 0x177   : > { %v1134_v60 = vpop.f32.mrb[4].mxu0 }
 0x178   : > { %v1247_v61 = vpop.f32.mrb[4].mxu1  ;;  %v1136_v62 = vpop.f32.mrb[5].mxu0 }
 0x179   : > { %v1249_v63 = vpop.f32.mrb[5].mxu1  ;;  %v2363_v0 = vpack.c.bf16 %v1136_v62, %v1134_v60  ;;  %v1138_v2 = vpop.f32.mrb[6].mxu0 }
 0x17a   : > { %v2364_v1 = vpack.c.bf16 %v1249_v63, %v1247_v61  ;;  %v1251_v3 = vpop.f32.mrb[6].mxu1  ;;  %v1140_v4 = vpop.f32.mrb[7].mxu0 }
 0x17b   : > { %v1253_v5 = vpop.f32.mrb[7].mxu1  ;;  %2014 = vst [vmem:[%s3093_s19 + $0x30] sm:$0xff] %v2363_v0  ;;  %v2366_v6 = vpack.c.bf16 %v1140_v4, %v1138_v2 }
 0x17c   : > { %2015 = vst [vmem:[%s3093_s19 + $0x38] sm:$0xff] %v2364_v1  ;;  %v2367_v7 = vpack.c.bf16 %v1253_v5, %v1251_v3 }
 0x17d   : > { %2017 = vst [vmem:[%s3093_s19 + $0x48] sm:$0xff] %v2366_v6 }
 0x17e   : > { %2018 = vst [vmem:[%s3093_s19 + $0x50] sm:$0xff] %v2367_v7 }
 0x17f   : > { %v1144_v8 = vpop.f32.mrb[8].mxu0 }
 0x180   : > { %v1257_v9 = vpop.f32.mrb[8].mxu1  ;;  %v1146_v10 = vpop.f32.mrb[9].mxu0 }
 0x181   : > { %v1259_v11 = vpop.f32.mrb[9].mxu1  ;;  %v2369_v12 = vpack.c.bf16 %v1146_v10, %v1144_v8  ;;  %v1148_v14 = vpop.f32.mrb[10].mxu0 }
 0x182   : > { %v2370_v13 = vpack.c.bf16 %v1259_v11, %v1257_v9  ;;  %v1261_v15 = vpop.f32.mrb[10].mxu1  ;;  %v1150_v16 = vpop.f32.mrb[11].mxu0 }
 0x183   : > { %v1263_v17 = vpop.f32.mrb[11].mxu1  ;;  %2020 = vst [vmem:[%s3093_s19 + $0x60] sm:$0xff] %v2369_v12  ;;  %v2372_v18 = vpack.c.bf16 %v1150_v16, %v1148_v14 }
 0x184   : > { %2021 = vst [vmem:[%s3093_s19 + $0x68] sm:$0xff] %v2370_v13  ;;  %v2373_v19 = vpack.c.bf16 %v1263_v17, %v1261_v15 }
 0x185   : > { %2023 = vst [vmem:[%s3093_s19 + $0x78] sm:$0xff] %v2372_v18 }
 0x186   : > { %2024 = vst [vmem:[%s3093_s19 + $0x80] sm:$0xff] %v2373_v19 }
 0x187   : > { %v1154_v20 = vpop.f32.mrb[12].mxu0 }
 0x188   : > { %v1267_v21 = vpop.f32.mrb[12].mxu1  ;;  %v1156_v22 = vpop.f32.mrb[13].mxu0 }
 0x189   : > { %v1269_v23 = vpop.f32.mrb[13].mxu1  ;;  %v2375_v24 = vpack.c.bf16 %v1156_v22, %v1154_v20  ;;  %v1158_v26 = vpop.f32.mrb[14].mxu0 }
 0x18a   : > { %v2376_v25 = vpack.c.bf16 %v1269_v23, %v1267_v21  ;;  %v1271_v27 = vpop.f32.mrb[14].mxu1  ;;  %v1160_v28 = vpop.f32.mrb[15].mxu0 }
 0x18b   : > { %v1273_v29 = vpop.f32.mrb[15].mxu1  ;;  %2026 = vst [vmem:[%s3093_s19 + $0x90] sm:$0xff] %v2375_v24  ;;  %v2378_v30 = vpack.c.bf16 %v1160_v28, %v1158_v26 }
 0x18c   : > { %2027 = vst [vmem:[%s3093_s19 + $0x98] sm:$0xff] %v2376_v25  ;;  %v2379_v31 = vpack.c.bf16 %v1273_v29, %v1271_v27 }
 0x18d   : > { %2029 = vst [vmem:[%s3093_s19 + $0xa8] sm:$0xff] %v2378_v30 }
 0x18e   : > { %2030 = vst [vmem:[%s3093_s19 + $0xb0] sm:$0xff] %v2379_v31 }
 0x18f   : > { %v1164_v32 = vpop.f32.mrb[16].mxu0 }
 0x190   : > { %v1277_v33 = vpop.f32.mrb[16].mxu1  ;;  %v1166_v34 = vpop.f32.mrb[17].mxu0 }
 0x191   : > { %v1279_v35 = vpop.f32.mrb[17].mxu1  ;;  %v2381_v36 = vpack.c.bf16 %v1166_v34, %v1164_v32  ;;  %v1168_v38 = vpop.f32.mrb[18].mxu0 }
 0x192   : > { %v2382_v37 = vpack.c.bf16 %v1279_v35, %v1277_v33  ;;  %v1281_v39 = vpop.f32.mrb[18].mxu1  ;;  %v1170_v40 = vpop.f32.mrb[19].mxu0 }
 0x193   : > { %v1283_v41 = vpop.f32.mrb[19].mxu1  ;;  %2032 = vst [vmem:[%s3093_s19 + $0xc0] sm:$0xff] %v2381_v36  ;;  %v2384_v42 = vpack.c.bf16 %v1170_v40, %v1168_v38 }
 0x194   : > { %2033 = vst [vmem:[%s3093_s19 + $0xc8] sm:$0xff] %v2382_v37  ;;  %v2385_v43 = vpack.c.bf16 %v1283_v41, %v1281_v39 }
 0x195   : > { %2035 = vst [vmem:[%s3093_s19 + $0xd8] sm:$0xff] %v2384_v42 }
 0x196   : > { %2036 = vst [vmem:[%s3093_s19 + $0xe0] sm:$0xff] %v2385_v43 }
 0x197   : > { %v1174_v44 = vpop.f32.mrb[20].mxu0 }
 0x198   : > { %v1287_v45 = vpop.f32.mrb[20].mxu1  ;;  %v1176_v46 = vpop.f32.mrb[21].mxu0 }
 0x199   : > { %v1289_v47 = vpop.f32.mrb[21].mxu1  ;;  %v2387_v48 = vpack.c.bf16 %v1176_v46, %v1174_v44  ;;  %v1178_v50 = vpop.f32.mrb[22].mxu0 }
 0x19a   : > { %v2388_v49 = vpack.c.bf16 %v1289_v47, %v1287_v45  ;;  %v1291_v51 = vpop.f32.mrb[22].mxu1  ;;  %v1180_v52 = vpop.f32.mrb[23].mxu0 }
 0x19b   : > { %v1293_v53 = vpop.f32.mrb[23].mxu1  ;;  %2038 = vst [vmem:[%s3093_s19 + $0xf0] sm:$0xff] %v2387_v48  ;;  %v2390_v54 = vpack.c.bf16 %v1180_v52, %v1178_v50 }
 0x19c   : > { %2039 = vst [vmem:[%s3093_s19 + $0xf8] sm:$0xff] %v2388_v49  ;;  %v2391_v55 = vpack.c.bf16 %v1293_v53, %v1291_v51 }
 0x19d   : > { %2041 = vst [vmem:[%s3093_s19 + $0x108] sm:$0xff] %v2390_v54 }
 0x19e   : > { %2042 = vst [vmem:[%s3093_s19 + $0x110] sm:$0xff] %v2391_v55 }
 0x19f   : > { %v1184_v56 = vpop.f32.mrb[24].mxu0 }
 0x1a0   : > { %v1297_v57 = vpop.f32.mrb[24].mxu1  ;;  %v1186_v58 = vpop.f32.mrb[25].mxu0 }
 0x1a1   : > { %v1299_v59 = vpop.f32.mrb[25].mxu1  ;;  %v2393_v60 = vpack.c.bf16 %v1186_v58, %v1184_v56  ;;  %v1188_v62 = vpop.f32.mrb[26].mxu0 }
 0x1a2   : > { %v2394_v61 = vpack.c.bf16 %v1299_v59, %v1297_v57  ;;  %v1301_v63 = vpop.f32.mrb[26].mxu1  ;;  %v1190_v0 = vpop.f32.mrb[27].mxu0 }
 0x1a3   : > { %v1303_v1 = vpop.f32.mrb[27].mxu1  ;;  %2044 = vst [vmem:[%s3093_s19 + $0x120] sm:$0xff] %v2393_v60  ;;  %v2396_v2 = vpack.c.bf16 %v1190_v0, %v1188_v62 }
 0x1a4   : > { %2045 = vst [vmem:[%s3093_s19 + $0x128] sm:$0xff] %v2394_v61  ;;  %v2397_v3 = vpack.c.bf16 %v1303_v1, %v1301_v63 }
 0x1a5   : > { %2047 = vst [vmem:[%s3093_s19 + $0x138] sm:$0xff] %v2396_v2 }
 0x1a6   : > { %2048 = vst [vmem:[%s3093_s19 + $0x140] sm:$0xff] %v2397_v3 }
 0x1a7   : > { %v1194_v4 = vpop.f32.mrb[28].mxu0 }
 0x1a8   : > { %v1307_v5 = vpop.f32.mrb[28].mxu1  ;;  %v1196_v6 = vpop.f32.mrb[29].mxu0 }
 0x1a9   : > { %v1309_v7 = vpop.f32.mrb[29].mxu1  ;;  %v2399_v8 = vpack.c.bf16 %v1196_v6, %v1194_v4  ;;  %v1198_v10 = vpop.f32.mrb[30].mxu0 }
 0x1aa   : > { %v2400_v9 = vpack.c.bf16 %v1309_v7, %v1307_v5  ;;  %v1311_v11 = vpop.f32.mrb[30].mxu1  ;;  %v1200_v12 = vpop.f32.mrb[31].mxu0 }
 0x1ab   : > { %v1313_v13 = vpop.f32.mrb[31].mxu1  ;;  %2050 = vst [vmem:[%s3093_s19 + $0x150] sm:$0xff] %v2399_v8  ;;  %v2402_v14 = vpack.c.bf16 %v1200_v12, %v1198_v10 }
 0x1ac   : > { %2051 = vst [vmem:[%s3093_s19 + $0x158] sm:$0xff] %v2400_v9  ;;  %v2403_v15 = vpack.c.bf16 %v1313_v13, %v1311_v11 }
 0x1ad   : > { %2053 = vst [vmem:[%s3093_s19 + $0x168] sm:$0xff] %v2402_v14 }
 0x1ae   : > { %2054 = vst [vmem:[%s3093_s19 + $0x170] sm:$0xff] %v2403_v15 }
 0x1af   : > { %v1350_v16 = vpop.f32.mrb[32].mxu0 }
 0x1b0   : > { %v1390_v17 = vpop.f32.mrb[32].mxu1  ;;  %v1352_v18 = vpop.f32.mrb[33].mxu0 }
 0x1b1   : > { %v1392_v19 = vpop.f32.mrb[33].mxu1  ;;  %v2359_v20 = vpack.c.bf16 %v1352_v18, %v1350_v16  ;;  %v1354_v22 = vpop.f32.mrb[34].mxu0 }
 0x1b2   : > { %v2383_v21 = vpack.c.bf16 %v1392_v19, %v1390_v17  ;;  %v1394_v23 = vpop.f32.mrb[34].mxu1  ;;  %v1356_v24 = vpop.f32.mrb[35].mxu0 }
 0x1b3   : > { %v1396_v25 = vpop.f32.mrb[35].mxu1  ;;  %2010 = vst [vmem:[%s3093_s19 + $0x10] sm:$0xff] %v2359_v20  ;;  %v2362_v26 = vpack.c.bf16 %v1356_v24, %v1354_v22 }
 0x1b4   : > { %2034 = vst [vmem:[%s3093_s19 + $0xd0] sm:$0xff] %v2383_v21  ;;  %v2386_v27 = vpack.c.bf16 %v1396_v25, %v1394_v23 }
 0x1b5   : > { %2013 = vst [vmem:[%s3093_s19 + $0x28] sm:$0xff] %v2362_v26 }
 0x1b6   : > { %2037 = vst [vmem:[%s3093_s19 + $0xe8] sm:$0xff] %v2386_v27 }
 0x1b7   : > { %v1360_v28 = vpop.f32.mrb[36].mxu0 }
 0x1b8   : > { %v1400_v29 = vpop.f32.mrb[36].mxu1  ;;  %v1362_v30 = vpop.f32.mrb[37].mxu0 }
 0x1b9   : > { %v1402_v31 = vpop.f32.mrb[37].mxu1  ;;  %v2365_v32 = vpack.c.bf16 %v1362_v30, %v1360_v28  ;;  %v1364_v34 = vpop.f32.mrb[38].mxu0 }
 0x1ba   : > { %v2389_v33 = vpack.c.bf16 %v1402_v31, %v1400_v29  ;;  %v1404_v35 = vpop.f32.mrb[38].mxu1  ;;  %v1366_v36 = vpop.f32.mrb[39].mxu0 }
 0x1bb   : > { %v1406_v37 = vpop.f32.mrb[39].mxu1  ;;  %2016 = vst [vmem:[%s3093_s19 + $0x40] sm:$0xff] %v2365_v32  ;;  %v2368_v38 = vpack.c.bf16 %v1366_v36, %v1364_v34 }
 0x1bc   : > { %2040 = vst [vmem:[%s3093_s19 + $0x100] sm:$0xff] %v2389_v33  ;;  %v2392_v39 = vpack.c.bf16 %v1406_v37, %v1404_v35 }
 0x1bd   : > { %2019 = vst [vmem:[%s3093_s19 + $0x58] sm:$0xff] %v2368_v38 }
 0x1be   : > { %2043 = vst [vmem:[%s3093_s19 + $0x118] sm:$0xff] %v2392_v39 }
 0x1bf   : > { %v1370_v40 = vpop.f32.mrb[40].mxu0 }
 0x1c0   : > { %v1410_v41 = vpop.f32.mrb[40].mxu1  ;;  %v1372_v42 = vpop.f32.mrb[41].mxu0 }
 0x1c1   : > { %v1412_v43 = vpop.f32.mrb[41].mxu1  ;;  %v2371_v44 = vpack.c.bf16 %v1372_v42, %v1370_v40  ;;  %v1374_v46 = vpop.f32.mrb[42].mxu0 }
 0x1c2   : > { %v2395_v45 = vpack.c.bf16 %v1412_v43, %v1410_v41  ;;  %v1414_v47 = vpop.f32.mrb[42].mxu1  ;;  %v1376_v48 = vpop.f32.mrb[43].mxu0 }
 0x1c3   : > { %v1416_v49 = vpop.f32.mrb[43].mxu1  ;;  %2022 = vst [vmem:[%s3093_s19 + $0x70] sm:$0xff] %v2371_v44  ;;  %v2374_v50 = vpack.c.bf16 %v1376_v48, %v1374_v46 }
 0x1c4   : > { %2046 = vst [vmem:[%s3093_s19 + $0x130] sm:$0xff] %v2395_v45  ;;  %v2398_v51 = vpack.c.bf16 %v1416_v49, %v1414_v47 }
 0x1c5   : > { %2025 = vst [vmem:[%s3093_s19 + $0x88] sm:$0xff] %v2374_v50 }
 0x1c6   : > { %2049 = vst [vmem:[%s3093_s19 + $0x148] sm:$0xff] %v2398_v51 }
 0x1c7   : > { %v1380_v52 = vpop.f32.mrb[44].mxu0 }
 0x1c8   : > { %v1420_v53 = vpop.f32.mrb[44].mxu1  ;;  %v1382_v54 = vpop.f32.mrb[45].mxu0 }
 0x1c9   : > { %v1422_v55 = vpop.f32.mrb[45].mxu1  ;;  %v2377_v56 = vpack.c.bf16 %v1382_v54, %v1380_v52  ;;  %v1384_v58 = vpop.f32.mrb[46].mxu0 }
 0x1ca   : > { %v2401_v57 = vpack.c.bf16 %v1422_v55, %v1420_v53  ;;  %v1424_v59 = vpop.f32.mrb[46].mxu1  ;;  %v1386_v60 = vpop.f32.mrb[47].mxu0 }
 0x1cb   : > { %v1426_v61 = vpop.f32.mrb[47].mxu1  ;;  %2028 = vst [vmem:[%s3093_s19 + $0xa0] sm:$0xff] %v2377_v56  ;;  %v2380_v62 = vpack.c.bf16 %v1386_v60, %v1384_v58 }
 0x1cc   : > { %2052 = vst [vmem:[%s3093_s19 + $0x160] sm:$0xff] %v2401_v57  ;;  %v2404_v63 = vpack.c.bf16 %v1426_v61, %v1424_v59 }
 0x1cd   : > { %2031 = vst [vmem:[%s3093_s19 + $0xb8] sm:$0xff] %v2380_v62 }
 0x1ce   : > { %2055 = vst [vmem:[%s3093_s19 + $0x178] sm:$0xff] %v2404_v63 }
 0x1cf   : > { %2757 = shalt.err (!%p2754_p5)
}
 0x1d0   : > { %s2758_s3 = scalar_lea.hbm %s3144_s7, 6144  ;;  %s2762_s16 = scalar_lea.hbm %s3200_s2, 24576 }
 0x1d1   : > { %p2759_p9 = scmp.ne.s32.totalorder %s3144_s7, %s2758_s3  ;;  %p2763_p3 = scmp.lt.u32.totalorder %s3144_s7, %s3200_s2 }
 0x1d2   : > { %p2764_p7 = scmp.lt.u32.totalorder %s2762_s16, %s2758_s3  ;;  %p2766_p4 = scmp.lt.u32.totalorder %s2758_s3, %s3144_s7 }
 0x1d3   : > { %p2760_p1 = pnand %p2759_p9, %p2951_p11 }
 0x1d4   : > { %p2765_p13 = por %p2764_p7, %p2763_p3 }
 0x1d5   : > { %p2761_p2 = pneg %p2760_p1 }
 0x1d6   : > { %p2767_p6 = por %p2766_p4, %p2765_p13 }
 0x1d8   : > { %p2768_p8 = pnand %p2767_p6, %p2761_p2 }
 0x1da   : > { %2771 = shalt.err (!%p2768_p8)
}
 0x1db   : > { %s2839_s17 = smov 384   ;;  %s2840_s19 = smov 24  }
 0x1dc   : > { %2445 = dma.vmem_to_hbm [thread:$0]  (%p2951_p11), %s3146_s4, 6144, %s3144_s7, %s2057_s12, %s2839_s17, %s2839_s17, %s2840_s19  }
 0x1dd PF: > { %p2462_p12 = scmp.ge.s32.totalorder %s2830_s14, 2  ;;  %s2088_s21 = sand.u32 1, %s2810_s9  }
 0x1de   : > { %p3218_p10 = scmp.ne.s32.totalorder %s3208_s20, 0  ;;  %s2089_s5 = scalar_lea.sflag [#allocation5], %s2088_s21 }
 0x1e0   : > { %p2456_p0 = pnand %p2462_p12, %p3218_p10 }
 0x1e2   : > { %2805 = dma.done.wait (!%p2456_p0), %s2089_s5, 6144  }
 0x1e3   : > { %2807 = vsyncadd (!%p2456_p0), %s2089_s5, 4294961152  ;;  %s19_s14 = sadd.s32 1, %s2830_s14   ;;  %s3219_s9 = smov %s2814_s10 }
 0x1e4   : > { %p16_p5 = scmp.ge.s32.totalorder %s19_s14, 6   ;;  %s3220_s10 = smov %s2818_s11 }
 0x1e5   : > { %s3221_s11 = smov %s2960_s28  ;;  %s3222_s12 = smov %s2826_s13 }
 0x1e6   : > { %s3223_s13 = smov %s3225_s25  ;;  %18 = sbr.rel (!%p16_p5) target bundleno = 7 (0x7), region = 86 }
 0x1ed   :  { %2094 = vsyncpa [#allocation4], 1 }
 0x1ee   :  { %2096 = vsyncpa [#allocation4 + $0x1], 1 }
 0x1ef   :  { %2097 = vsyncpa [#allocation7], 1 }
 0x1f0   :  { %2098 = vsyncpa [#allocation5], 1 }
 0x1f1   :  { %2100 = vsyncpa [#allocation5 + $0x1], 1 }

</bundles_post_ra>
